<compile_context>
chip_gen: v7x
topology: tpu7x:2x2x1
jax: 0.10.0
libtpu: 0.0.40
codegen_flags: <defaults>
</compile_context>

<pallas_src>
import functools

import jax
import jax.numpy as jnp
from jax.experimental import pallas as pl
from jax.experimental.pallas import tpu as pltpu

EPS = 1e-9          # matches nn.BatchNorm2d(out_channel, eps=1e-09)
LANE = 128


def _round_up(x, m):
    return ((x + m - 1) // m) * m


def _vmem_capacity_bytes():
    try:
        cap = int(pltpu.get_tpu_info().vmem_capacity_bytes)
    except Exception:
        cap = 64 * 1024 * 1024          # conservative (v7x per-core VMEM)
    return max(cap, 32 * 1024 * 1024)


# ---------------------------------------------------------------- kernels ---

def _conv_stats_kernel(p_ref, w_ref, o_ref, sum_ref, sq_ref):
    """im2col matmul tile + fused per-channel sum / sum-of-sq epilogue.

    Grid = (group, MO, MI).  MI is the reduction axis for the stats
    accumulators (output-resident (8, OCp) block per (group, MO)), so the
    group and MO axes stay "parallel".  The reduction rides VPU/XLU slots
    that have slack while the MXU runs.
    """
    @pl.when(pl.program_id(2) == 0)
    def _():
        sum_ref[...] = jnp.zeros_like(sum_ref)
        sq_ref[...] = jnp.zeros_like(sq_ref)

    y = jnp.dot(p_ref[...], w_ref[...], preferred_element_type=jnp.float32)
    o_ref[...] = y
    # partial sums live in sublane row 0; the other 7 rows stay zero.
    sum_ref[0:1, :] += jnp.sum(y, axis=0, keepdims=True)
    sq_ref[0:1, :] += jnp.sum(y * y, axis=0, keepdims=True)


def _bn_relu_kernel(y_ref, scale_ref, shift_ref, o_ref, *, has_bn, has_relu):
    y = y_ref[...]
    if has_bn:
        y = y * scale_ref[...] + shift_ref[...]      # folded BN: one FMA
    if has_relu:
        y = jnp.maximum(y, 0.0)
    o_ref[...] = y


# ---------------------------------------------------------------- wrapper ---

def conv_bn_relu(x, weight, gamma, beta, *, stride=1, padding=0, groups=1,
                 has_bn=True, has_relu=True):
    """x: (N, C, H, W) f32; weight: (OC, C//groups, KH, KW) f32."""
    N, C, H, W = x.shape
    OC, Cg, KH, KW = weight.shape
    assert C % groups == 0 and OC % groups == 0 and Cg == C // groups
    s, p = stride, padding
    OH = (H + 2 * p - KH) // s + 1
    OW = (W + 2 * p - KW) // s + 1

    OCg = OC // groups
    OCgp = _round_up(OCg, LANE)          # lane-dense output channels
    Kg = Cg * KH * KW
    M = N * OH * OW

    # ---- tile sizing (generation aware) ----
    vmem_cap = _vmem_capacity_bytes()
    budget = vmem_cap // 2               # leave headroom for Mosaic internals
    TM = 128
    for cand in (1024, 512, 256, 128):
        est = 2 * (cand * Kg * 2 + Kg * OCgp * 2 + cand * OCgp * 4) \
            + 4 * (8 * OCgp * 4)
        if est <= budget:
            TM = cand
            break
    TM = min(TM, max(128, _round_up(M, 128)))      # don't tile far past M
    vmem_limit = int(min(vmem_cap - (8 << 20), budget + (16 << 20)))

    num_m_tiles = -(-M // TM)
    MO = 2 if num_m_tiles >= 2 else 1    # megacore partial-sum axis
    MI = -(-num_m_tiles // MO)
    Mp = TM * MO * MI

    # ---- im2col (glue, plain JAX), bf16 feed for the MXU ----
    # TODO(synk): for KH*KW > 1, replace materialized im2col with KH*KW shifted
    # [TM, C] @ [C, OC] accumulations via manual DMA of overlapping row windows
    # (removes the KH*KW x HBM blowup); depthwise (groups == C) should bypass
    # the MXU entirely and use a VPU stencil kernel.
    xb = x.astype(jnp.bfloat16)
    xp = jnp.pad(xb, ((0, 0), (0, 0), (p, p), (p, p)))
    pats = []
    for i in range(KH):
        for j in range(KW):
            pats.append(xp[:, :, i:i + s * OH:s, j:j + s * OW:s])  # (N,C,OH,OW)
    cols = jnp.stack(pats, axis=2)                 # (N, C, KH*KW, OH, OW)
    cols = cols.transpose(0, 3, 4, 1, 2)           # (N, OH, OW, C, KH*KW)
    cols = cols.reshape(M, groups, Kg)             # K order = (cg, kh, kw)
    cols = cols.transpose(1, 0, 2)                 # (groups, M, Kg)
    cols = jnp.pad(cols, ((0, 0), (0, Mp - M), (0, 0)))   # zero rows: inert

    wmat = weight.astype(jnp.bfloat16).reshape(groups, OCg, Kg)
    wmat = wmat.transpose(0, 2, 1)                 # (groups, Kg, OCg)
    wmat = jnp.pad(wmat, ((0, 0), (0, 0), (0, OCgp - OCg)))

    # ---- conv matmul with fused BN statistics (single pallas_call) ----
    y, sums, sqs = pl.pallas_call(
        _conv_stats_kernel,
        out_shape=(jax.ShapeDtypeStruct((groups, Mp, OCgp), jnp.float32),
                   jax.ShapeDtypeStruct((groups, MO * 8, OCgp), jnp.float32),
                   jax.ShapeDtypeStruct((groups, MO * 8, OCgp), jnp.float32)),
        grid=(groups, MO, MI),
        in_specs=[
            pl.BlockSpec((None, TM, Kg),
                         lambda g, mo, mi: (g, mo * MI + mi, 0)),
            pl.BlockSpec((None, Kg, OCgp),
                         lambda g, mo, mi: (g, 0, 0)),
        ],
        out_specs=(
            pl.BlockSpec((None, TM, OCgp),
                         lambda g, mo, mi: (g, mo * MI + mi, 0)),
            pl.BlockSpec((None, 8, OCgp), lambda g, mo, mi: (g, mo, 0)),
            pl.BlockSpec((None, 8, OCgp), lambda g, mo, mi: (g, mo, 0)),
        ),
        compiler_params=pltpu.CompilerParams(
            dimension_semantics=("parallel", "parallel", "arbitrary"),
            vmem_limit_bytes=vmem_limit),
    )(cols, wmat)

    # ---- fold BN into scale/shift (tiny, plain JAX) ----
    if has_bn:
        csum = sums.sum(axis=1)                    # (groups, OCgp)
        csq = sqs.sum(axis=1)
        mean = csum / M
        var = jnp.maximum(csq / M - mean * mean, 0.0)   # biased var, clamped
        inv = jax.lax.rsqrt(var + EPS)
        gpad = jnp.pad(gamma.reshape(groups, OCg), ((0, 0), (0, OCgp - OCg)))
        bpad = jnp.pad(beta.reshape(groups, OCg), ((0, 0), (0, OCgp - OCg)))
        scale = (gpad * inv).reshape(groups, 1, OCgp)
        shift = (bpad - mean * gpad * inv).reshape(groups, 1, OCgp)
    else:
        scale = jnp.ones((groups, 1, OCgp), jnp.float32)
        shift = jnp.zeros((groups, 1, OCgp), jnp.float32)

    # ---- BN apply + ReLU, output aliased onto the conv slab ----
    if has_bn or has_relu:
        kern = functools.partial(_bn_relu_kernel,
                                 has_bn=has_bn, has_relu=has_relu)
        y = pl.pallas_call(
            kern,
            out_shape=jax.ShapeDtypeStruct((groups, Mp, OCgp), jnp.float32),
            grid=(groups, Mp // TM),
            in_specs=[
                pl.BlockSpec((None, TM, OCgp), lambda g, i: (g, i, 0)),
                pl.BlockSpec((None, 1, OCgp), lambda g, i: (g, 0, 0)),
                pl.BlockSpec((None, 1, OCgp), lambda g, i: (g, 0, 0)),
            ],
            out_specs=pl.BlockSpec((None, TM, OCgp), lambda g, i: (g, i, 0)),
            input_output_aliases={0: 0},           # reuse the conv slab in HBM
            compiler_params=pltpu.CompilerParams(
                dimension_semantics=("parallel", "parallel"),
                vmem_limit_bytes=vmem_limit),
        )(y, scale, shift)

    # ---- strip padding, back to NCHW ----
    out = y[:, :M, :OCg]                           # (groups, M, OCg)
    out = out.transpose(1, 0, 2).reshape(N, OH, OW, OC)
    return out.transpose(0, 3, 1, 2)


# ------------------------------------------------------------------- main ---

if __name__ == "__main__":
    # Module config: Conv_BN_ReLU(in=4, out=8, k=3, stride=1, padding=1)
    N, Cin, H, W = 2, 4, 16, 16
    OC, K, stride, padding, groups = 8, 3, 1, 1, 1

    key = jax.random.PRNGKey(0)
    kx, kw = jax.random.split(key)
    x = jax.random.normal(kx, (N, Cin, H, W), dtype=jnp.float32)
    weight = jax.random.normal(kw, (OC, Cin // groups, K, K),
                               dtype=jnp.float32) * 0.1
    gamma = jnp.ones((OC,), jnp.float32)   # PyTorch BN default affine init
    beta = jnp.zeros((OC,), jnp.float32)

    fn = jax.jit(functools.partial(conv_bn_relu, stride=stride,
                                   padding=padding, groups=groups,
                                   has_bn=True, has_relu=True))
    out = jax.block_until_ready(fn(x, weight, gamma, beta))

    # reference check (plain JAX / XLA); conv inputs rounded to bf16 to match
    # the bf16 MXU feed, all accumulation / BN math in f32.
    xr = x.astype(jnp.bfloat16).astype(jnp.float32)
    wr = weight.astype(jnp.bfloat16).astype(jnp.float32)
    ref = jax.lax.conv_general_dilated(
        xr, wr, (stride, stride), [(padding, padding), (padding, padding)],
        dimension_numbers=("NCHW", "OIHW", "NCHW"), feature_group_count=groups,
        precision=jax.lax.Precision.HIGHEST)
    mu = ref.mean(axis=(0, 2, 3), keepdims=True)
    va = ref.var(axis=(0, 2, 3), keepdims=True)
    ref = (ref - mu) * jax.lax.rsqrt(va + EPS)
    ref = ref * gamma[None, :, None, None] + beta[None, :, None, None]
    ref = jnp.maximum(ref, 0.0)

    assert out.shape == ref.shape == (N, OC, H, W)
    assert jnp.allclose(out, ref, atol=1e-3, rtol=1e-3), "mismatch vs reference"
    print("KERNEL_OK")
</pallas_src>

<mosaic_0001>
module attributes {stable_mosaic.version = 11 : i64} {
  func.func @_conv_stats_kernel(%arg0: i32, %arg1: i32, %arg2: i32, %arg3: memref<1x512x36xbf16, #tpu.memory_space<vmem>>, %arg4: memref<1x36x128xbf16, #tpu.memory_space<vmem>>, %arg5: memref<1x512x128xf32, #tpu.memory_space<vmem>>, %arg6: memref<1x8x128xf32, #tpu.memory_space<vmem>>, %arg7: memref<1x8x128xf32, #tpu.memory_space<vmem>>) attributes {dimension_semantics = [#tpu.dimension_semantics<parallel>, #tpu.dimension_semantics<parallel>, #tpu.dimension_semantics<arbitrary>], iteration_bounds = array<i64: 1, 1, 1>, scalar_prefetch = 0 : i64, scratch_operands = 0 : i64, tpu.core_type = #tpu.core_type<tc>, window_params = [{transform_indices = @transform_0, window_bounds = array<i64: 1, 512, 36>}, {transform_indices = @transform_1, window_bounds = array<i64: 1, 36, 128>}, {transform_indices = @transform_2, window_bounds = array<i64: 1, 512, 128>}, {transform_indices = @transform_3, window_bounds = array<i64: 1, 8, 128>}, {transform_indices = @transform_4, window_bounds = array<i64: 1, 8, 128>}]} {
    %c0_i32 = arith.constant 0 : i32
    %0 = arith.cmpi eq, %arg2, %c0_i32 : i32
    %1 = arith.extui %0 : i1 to i32
    %c0_i32_0 = arith.constant 0 : i32
    %2 = arith.cmpi ne, %1, %c0_i32_0 : i32
    scf.if %2 {
      %cst_23 = arith.constant 0.000000e+00 : f32
      %28 = vector.broadcast %cst_23 : f32 to vector<8x128xf32>
      %c0_24 = arith.constant 0 : index
      %c0_25 = arith.constant 0 : index
      %c0_26 = arith.constant 0 : index
      %29 = vector.load %arg6[%c0_24, %c0_25, %c0_26] : memref<1x8x128xf32, #tpu.memory_space<vmem>>, vector<1x8x128xf32>
      %30 = vector.shape_cast %29 : vector<1x8x128xf32> to vector<8x128xf32>
      %31 = vector.shape_cast %28 : vector<8x128xf32> to vector<1x8x128xf32>
      tpu.vector_store %arg6[%c0_24, %c0_25, %c0_26], %31 {strides = array<i32>} : memref<1x8x128xf32, #tpu.memory_space<vmem>>, vector<1x8x128xf32>,
      %cst_27 = arith.constant 0.000000e+00 : f32
      %32 = vector.broadcast %cst_27 : f32 to vector<8x128xf32>
      %c0_28 = arith.constant 0 : index
      %c0_29 = arith.constant 0 : index
      %c0_30 = arith.constant 0 : index
      %33 = vector.load %arg7[%c0_28, %c0_29, %c0_30] : memref<1x8x128xf32, #tpu.memory_space<vmem>>, vector<1x8x128xf32>
      %34 = vector.shape_cast %33 : vector<1x8x128xf32> to vector<8x128xf32>
      %35 = vector.shape_cast %32 : vector<8x128xf32> to vector<1x8x128xf32>
      tpu.vector_store %arg7[%c0_28, %c0_29, %c0_30], %35 {strides = array<i32>} : memref<1x8x128xf32, #tpu.memory_space<vmem>>, vector<1x8x128xf32>,
    } else {
    }
    %c0 = arith.constant 0 : index
    %c0_1 = arith.constant 0 : index
    %c0_2 = arith.constant 0 : index
    %3 = vector.load %arg3[%c0, %c0_1, %c0_2] : memref<1x512x36xbf16, #tpu.memory_space<vmem>>, vector<1x512x36xbf16>
    %4 = vector.shape_cast %3 : vector<1x512x36xbf16> to vector<512x36xbf16>
    %c0_3 = arith.constant 0 : index
    %c0_4 = arith.constant 0 : index
    %c0_5 = arith.constant 0 : index
    %5 = vector.load %arg4[%c0_3, %c0_4, %c0_5] : memref<1x36x128xbf16, #tpu.memory_space<vmem>>, vector<1x36x128xbf16>
    %6 = vector.shape_cast %5 : vector<1x36x128xbf16> to vector<36x128xbf16>
    %cst = arith.constant dense<0.000000e+00> : vector<512x128xf32>
    %7 = tpu.matmul %4, %6, %cst {dimension_numbers = #tpu.dot_dimension_numbers<[1], [0], [0], [1], [0, 0, 1, 1], [], []>} : vector<512x36xbf16>, vector<36x128xbf16>, vector<512x128xf32> -> vector<512x128xf32>
    %c0_6 = arith.constant 0 : index
    %c0_7 = arith.constant 0 : index
    %c0_8 = arith.constant 0 : index
    %8 = vector.load %arg5[%c0_6, %c0_7, %c0_8] : memref<1x512x128xf32, #tpu.memory_space<vmem>>, vector<1x512x128xf32>
    %9 = vector.shape_cast %8 : vector<1x512x128xf32> to vector<512x128xf32>
    %10 = vector.shape_cast %7 : vector<512x128xf32> to vector<1x512x128xf32>
    tpu.vector_store %arg5[%c0_6, %c0_7, %c0_8], %10 {strides = array<i32>} : memref<1x512x128xf32, #tpu.memory_space<vmem>>, vector<1x512x128xf32>,
    %c0_9 = arith.constant 0 : index
    %c0_10 = arith.constant 0 : index
    %c0_11 = arith.constant 0 : index
    %11 = vector.load %arg6[%c0_9, %c0_10, %c0_11] : memref<1x8x128xf32, #tpu.memory_space<vmem>>, vector<1x1x128xf32>
    %12 = vector.shape_cast %11 : vector<1x1x128xf32> to vector<1x128xf32>
    %cst_12 = arith.constant dense<0.000000e+00> : vector<128xf32>
    %13 = vector.multi_reduction <add>, %7, %cst_12 [0] : vector<512x128xf32> to vector<128xf32>
    %14 = vector.shape_cast %13 : vector<128xf32> to vector<1x128xf32>
    %15 = arith.addf %12, %14 : vector<1x128xf32>
    %c0_13 = arith.constant 0 : index
    %c0_14 = arith.constant 0 : index
    %c0_15 = arith.constant 0 : index
    %16 = vector.load %arg6[%c0_13, %c0_14, %c0_15] : memref<1x8x128xf32, #tpu.memory_space<vmem>>, vector<1x1x128xf32>
    %17 = vector.shape_cast %16 : vector<1x1x128xf32> to vector<1x128xf32>
    %18 = vector.shape_cast %15 : vector<1x128xf32> to vector<1x1x128xf32>
    tpu.vector_store %arg6[%c0_13, %c0_14, %c0_15], %18 {strides = array<i32>} : memref<1x8x128xf32, #tpu.memory_space<vmem>>, vector<1x1x128xf32>,
    %c0_16 = arith.constant 0 : index
    %c0_17 = arith.constant 0 : index
    %c0_18 = arith.constant 0 : index
    %19 = vector.load %arg7[%c0_16, %c0_17, %c0_18] : memref<1x8x128xf32, #tpu.memory_space<vmem>>, vector<1x1x128xf32>
    %20 = vector.shape_cast %19 : vector<1x1x128xf32> to vector<1x128xf32>
    %21 = arith.mulf %7, %7 : vector<512x128xf32>
    %cst_19 = arith.constant dense<0.000000e+00> : vector<128xf32>
    %22 = vector.multi_reduction <add>, %21, %cst_19 [0] : vector<512x128xf32> to vector<128xf32>
    %23 = vector.shape_cast %22 : vector<128xf32> to vector<1x128xf32>
    %24 = arith.addf %20, %23 : vector<1x128xf32>
    %c0_20 = arith.constant 0 : index
    %c0_21 = arith.constant 0 : index
    %c0_22 = arith.constant 0 : index
    %25 = vector.load %arg7[%c0_20, %c0_21, %c0_22] : memref<1x8x128xf32, #tpu.memory_space<vmem>>, vector<1x1x128xf32>
    %26 = vector.shape_cast %25 : vector<1x1x128xf32> to vector<1x128xf32>
    %27 = vector.shape_cast %24 : vector<1x128xf32> to vector<1x1x128xf32>
    tpu.vector_store %arg7[%c0_20, %c0_21, %c0_22], %27 {strides = array<i32>} : memref<1x8x128xf32, #tpu.memory_space<vmem>>, vector<1x1x128xf32>,
    return
  }
  func.func @transform_0(%arg0: i32, %arg1: i32, %arg2: i32) -> (i32, i32, i32) {
    %c1_i32 = arith.constant 1 : i32
    %0 = arith.muli %arg1, %c1_i32 : i32
    %1 = arith.addi %0, %arg2 : i32
    %c0_i32 = arith.constant 0 : i32
    %c0_i32_0 = arith.constant 0 : i32
    return %arg0, %1, %c0_i32 : i32, i32, i32
  }
  func.func @transform_1(%arg0: i32, %arg1: i32, %arg2: i32) -> (i32, i32, i32) {
    %c0_i32 = arith.constant 0 : i32
    %c0_i32_0 = arith.constant 0 : i32
    %c0_i32_1 = arith.constant 0 : i32
    return %arg0, %c0_i32, %c0_i32_0 : i32, i32, i32
  }
  func.func @transform_2(%arg0: i32, %arg1: i32, %arg2: i32) -> (i32, i32, i32) {
    %c1_i32 = arith.constant 1 : i32
    %0 = arith.muli %arg1, %c1_i32 : i32
    %1 = arith.addi %0, %arg2 : i32
    %c0_i32 = arith.constant 0 : i32
    %c0_i32_0 = arith.constant 0 : i32
    return %arg0, %1, %c0_i32 : i32, i32, i32
  }
  func.func @transform_3(%arg0: i32, %arg1: i32, %arg2: i32) -> (i32, i32, i32) {
    %c0_i32 = arith.constant 0 : i32
    %c0_i32_0 = arith.constant 0 : i32
    return %arg0, %arg1, %c0_i32 : i32, i32, i32
  }
  func.func @transform_4(%arg0: i32, %arg1: i32, %arg2: i32) -> (i32, i32, i32) {
    %c0_i32 = arith.constant 0 : i32
    %c0_i32_0 = arith.constant 0 : i32
    return %arg0, %arg1, %c0_i32 : i32, i32, i32
  }
}

module attributes {stable_mosaic.version = 11 : i64} {
  func.func @_bn_relu_kernel(%arg0: i32, %arg1: i32, %arg2: memref<1x512x128xf32, #tpu.memory_space<vmem>>, %arg3: memref<1x1x128xf32, #tpu.memory_space<vmem>>, %arg4: memref<1x1x128xf32, #tpu.memory_space<vmem>>, %arg5: memref<1x512x128xf32, #tpu.memory_space<vmem>>) attributes {dimension_semantics = [#tpu.dimension_semantics<parallel>, #tpu.dimension_semantics<parallel>], iteration_bounds = array<i64: 1, 1>, scalar_prefetch = 0 : i64, scratch_operands = 0 : i64, tpu.core_type = #tpu.core_type<tc>, window_params = [{transform_indices = @transform_0, window_bounds = array<i64: 1, 512, 128>}, {transform_indices = @transform_1, window_bounds = array<i64: 1, 1, 128>}, {transform_indices = @transform_2, window_bounds = array<i64: 1, 1, 128>}, {transform_indices = @transform_3, window_bounds = array<i64: 1, 512, 128>}]} {
    %c0 = arith.constant 0 : index
    %c0_0 = arith.constant 0 : index
    %c0_1 = arith.constant 0 : index
    %0 = vector.load %arg2[%c0, %c0_0, %c0_1] : memref<1x512x128xf32, #tpu.memory_space<vmem>>, vector<1x512x128xf32>
    %1 = vector.shape_cast %0 : vector<1x512x128xf32> to vector<512x128xf32>
    %c0_2 = arith.constant 0 : index
    %c0_3 = arith.constant 0 : index
    %c0_4 = arith.constant 0 : index
    %2 = vector.load %arg3[%c0_2, %c0_3, %c0_4] : memref<1x1x128xf32, #tpu.memory_space<vmem>>, vector<1x1x128xf32>
    %3 = vector.shape_cast %2 : vector<1x1x128xf32> to vector<1x128xf32>
    %4 = vector.broadcast %3 : vector<1x128xf32> to vector<512x128xf32>
    %5 = arith.mulf %1, %4 : vector<512x128xf32>
    %c0_5 = arith.constant 0 : index
    %c0_6 = arith.constant 0 : index
    %c0_7 = arith.constant 0 : index
    %6 = vector.load %arg4[%c0_5, %c0_6, %c0_7] : memref<1x1x128xf32, #tpu.memory_space<vmem>>, vector<1x1x128xf32>
    %7 = vector.shape_cast %6 : vector<1x1x128xf32> to vector<1x128xf32>
    %8 = vector.broadcast %7 : vector<1x128xf32> to vector<512x128xf32>
    %9 = arith.addf %5, %8 : vector<512x128xf32>
    %cst = arith.constant 0.000000e+00 : f32
    %10 = vector.broadcast %cst : f32 to vector<512x128xf32>
    %11 = arith.maximumf %9, %10 : vector<512x128xf32>
    %c0_8 = arith.constant 0 : index
    %c0_9 = arith.constant 0 : index
    %c0_10 = arith.constant 0 : index
    %12 = vector.load %arg5[%c0_8, %c0_9, %c0_10] : memref<1x512x128xf32, #tpu.memory_space<vmem>>, vector<1x512x128xf32>
    %13 = vector.shape_cast %12 : vector<1x512x128xf32> to vector<512x128xf32>
    %14 = vector.shape_cast %11 : vector<512x128xf32> to vector<1x512x128xf32>
    tpu.vector_store %arg5[%c0_8, %c0_9, %c0_10], %14 {strides = array<i32>} : memref<1x512x128xf32, #tpu.memory_space<vmem>>, vector<1x512x128xf32>,
    return
  }
  func.func @transform_0(%arg0: i32, %arg1: i32) -> (i32, i32, i32) {
    %c0_i32 = arith.constant 0 : i32
    %c0_i32_0 = arith.constant 0 : i32
    return %arg0, %arg1, %c0_i32 : i32, i32, i32
  }
  func.func @transform_1(%arg0: i32, %arg1: i32) -> (i32, i32, i32) {
    %c0_i32 = arith.constant 0 : i32
    %c0_i32_0 = arith.constant 0 : i32
    %c0_i32_1 = arith.constant 0 : i32
    return %arg0, %c0_i32, %c0_i32_0 : i32, i32, i32
  }
  func.func @transform_2(%arg0: i32, %arg1: i32) -> (i32, i32, i32) {
    %c0_i32 = arith.constant 0 : i32
    %c0_i32_0 = arith.constant 0 : i32
    %c0_i32_1 = arith.constant 0 : i32
    return %arg0, %c0_i32, %c0_i32_0 : i32, i32, i32
  }
  func.func @transform_3(%arg0: i32, %arg1: i32) -> (i32, i32, i32) {
    %c0_i32 = arith.constant 0 : i32
    %c0_i32_0 = arith.constant 0 : i32
    return %arg0, %arg1, %c0_i32 : i32, i32, i32
  }
}

</mosaic_0001>

<bundles_post_ra>
// kernel: conv_bn_relu.3
= control target key start
LH: loop header
LB: loop body
LE: loop exit
PB: predicated region body
PF: predicated region fallthrough
CT: control target
= control target key end

     0   :  { %s896_s0 = inlined_call_operand.vmem [shape: f32[1,512,128], index: 0, kind: input, shape index: {}, may-alias: {0,3}]   ;;  %s897_s1 = inlined_call_operand.vmem [shape: f32[1,1,128], index: 1, kind: input, shape index: {}]   ;;  %s898_s2 = inlined_call_operand.vmem [shape: f32[1,1,128], index: 2, kind: input, shape index: {}]   ;;  %s899_s3 = inlined_call_operand.vmem [shape: f32[1,512,128], index: 3, kind: output, shape index: {}, may-alias: {0,3}]  }
   0x1   :  { %v14_v0 = vld [vmem:[%s896_s0] sm:$0xff]  ;;  %v15_v4 = vld [vmem:[%s896_s0 + $0x8] sm:$0xff]  ;;  %v16_v5 = vld [vmem:[%s896_s0 + $0x10] sm:$0xff] }
   0x2   :  { %v380_v1 = vld [vmem:[%s897_s1] ss:$0 sm:$0xff]  ;;  %v17_v6 = vld [vmem:[%s896_s0 + $0x18] sm:$0xff]  ;;  %v19_v11 = vld [vmem:[%s896_s0 + $0x28] sm:$0xff] }
   0x3   :  { %v385_v2 = vld [vmem:[%s898_s2] ss:$0 sm:$0xff]  ;;  %v85_v3 = vmul.f32 %v380_v1, %v14_v0  ;;  %v86_v7 = vmul.f32 %v380_v1, %v15_v4  ;;  %v87_v8 = vmul.f32 %v380_v1, %v16_v5  ;;  %v88_v9 = vmul.f32 %v380_v1, %v17_v6  ;;  %v20_v12 = vld [vmem:[%s896_s0 + $0x30] sm:$0xff]  ;;  %v21_v17 = vld [vmem:[%s896_s0 + $0x38] sm:$0xff] }
   0x4   :  { %v18_v10 = vld [vmem:[%s896_s0 + $0x20] sm:$0xff]  ;;  %v90_v15 = vmul.f32 %v380_v1, %v19_v11  ;;  %v91_v16 = vmul.f32 %v380_v1, %v20_v12  ;;  %v92_v21 = vmul.f32 %v380_v1, %v21_v17  ;;  %v23_v27 = vld [vmem:[%s896_s0 + $0x48] sm:$0xff]  ;;  %v24_v28 = vld [vmem:[%s896_s0 + $0x50] sm:$0xff] }
   0x5   :  { %v156_v13 = vadd.f32 %v385_v2, %v85_v3  ;;  %v89_v14 = vmul.f32 %v380_v1, %v18_v10  ;;  %v157_v18 = vadd.f32 %v385_v2, %v86_v7  ;;  %v158_v19 = vadd.f32 %v385_v2, %v87_v8  ;;  %v22_v22 = vld [vmem:[%s896_s0 + $0x40] sm:$0xff]  ;;  %v25_v29 = vld [vmem:[%s896_s0 + $0x58] sm:$0xff]  ;;  %v27_v35 = vld [vmem:[%s896_s0 + $0x68] sm:$0xff] }
   0x6   :  { %v159_v20 = vadd.f32 %v385_v2, %v88_v9  ;;  %v161_v25 = vadd.f32 %v385_v2, %v90_v15  ;;  %v162_v26 = vadd.f32 %v385_v2, %v91_v16  ;;  %v163_v33 = vadd.f32 %v385_v2, %v92_v21  ;;  %v26_v34 = vld [vmem:[%s896_s0 + $0x60] sm:$0xff]  ;;  %v28_v36 = vld [vmem:[%s896_s0 + $0x70] sm:$0xff] }
   0x7   :  { %v220_v23 = vmax.f32 %v156_v13, 0.0  ;;  %v160_v24 = vadd.f32 %v385_v2, %v89_v14  ;;  %v221_v30 = vmax.f32 %v157_v18, 0.0  ;;  %v222_v31 = vmax.f32 %v158_v19, 0.0 }
   0x8   :  { %v223_v32 = vmax.f32 %v159_v20, 0.0  ;;  %v225_v38 = vmax.f32 %v161_v25, 0.0  ;;  %v226_v39 = vmax.f32 %v162_v26, 0.0  ;;  %v93_v40 = vmul.f32 %v380_v1, %v22_v22 }
   0x9   :  { %284 = vst [vmem:[%s899_s3] sm:$0xff] %v220_v23  ;;  %v224_v37 = vmax.f32 %v160_v24, 0.0  ;;  %v227_v42 = vmax.f32 %v163_v33, 0.0  ;;  %v94_v43 = vmul.f32 %v380_v1, %v23_v27  ;;  %v95_v44 = vmul.f32 %v380_v1, %v24_v28 }
   0xa   :  { %v96_v45 = vmul.f32 %v380_v1, %v25_v29  ;;  %v164_v46 = vadd.f32 %v385_v2, %v93_v40  ;;  %v97_v47 = vmul.f32 %v380_v1, %v26_v34  ;;  %v98_v48 = vmul.f32 %v380_v1, %v27_v35 }
   0xb   :  { %v99_v49 = vmul.f32 %v380_v1, %v28_v36  ;;  %v165_v50 = vadd.f32 %v385_v2, %v94_v43  ;;  %v166_v51 = vadd.f32 %v385_v2, %v95_v44 }
   0xc   :  { %v167_v52 = vadd.f32 %v385_v2, %v96_v45  ;;  %v228_v55 = vmax.f32 %v164_v46, 0.0  ;;  %v168_v56 = vadd.f32 %v385_v2, %v97_v47  ;;  %v169_v57 = vadd.f32 %v385_v2, %v98_v48 }
   0xd   :  { %v170_v58 = vadd.f32 %v385_v2, %v99_v49  ;;  %v229_v62 = vmax.f32 %v165_v50, 0.0  ;;  %v230_v63 = vmax.f32 %v166_v51, 0.0 }
   0xe   :  { %v231_v0 = vmax.f32 %v167_v52, 0.0  ;;  %v232_v7 = vmax.f32 %v168_v56, 0.0  ;;  %v233_v8 = vmax.f32 %v169_v57, 0.0 }
   0xf   :  { %v234_v9 = vmax.f32 %v170_v58, 0.0 }
  0x10   :  { %v29_v41 = vld [vmem:[%s896_s0 + $0x78] sm:$0xff] }
  0x11   :  { %285 = vst [vmem:[%s899_s3 + $0x8] sm:$0xff] %v221_v30  ;;  %286 = vst [vmem:[%s899_s3 + $0x10] sm:$0xff] %v222_v31  ;;  %v100_v53 = vmul.f32 %v380_v1, %v29_v41 }
  0x12   :  { %287 = vst [vmem:[%s899_s3 + $0x18] sm:$0xff] %v223_v32  ;;  %288 = vst [vmem:[%s899_s3 + $0x20] sm:$0xff] %v224_v37 }
  0x13   :  { %289 = vst [vmem:[%s899_s3 + $0x28] sm:$0xff] %v225_v38  ;;  %290 = vst [vmem:[%s899_s3 + $0x30] sm:$0xff] %v226_v39  ;;  %v171_v3 = vadd.f32 %v385_v2, %v100_v53 }
  0x14   :  { %291 = vst [vmem:[%s899_s3 + $0x38] sm:$0xff] %v227_v42 }
  0x15   :  { %v235_v12 = vmax.f32 %v171_v3, 0.0 }
  0x1b   :  { %v30_v54 = vld [vmem:[%s896_s0 + $0x80] sm:$0xff]  ;;  %v31_v59 = vld [vmem:[%s896_s0 + $0x88] sm:$0xff]  ;;  %v32_v60 = vld [vmem:[%s896_s0 + $0x90] sm:$0xff] }
  0x1c   :  { %v33_v61 = vld [vmem:[%s896_s0 + $0x98] sm:$0xff]  ;;  %v34_v4 = vld [vmem:[%s896_s0 + $0xa0] sm:$0xff]  ;;  %v35_v5 = vld [vmem:[%s896_s0 + $0xa8] sm:$0xff]  ;;  %v101_v10 = vmul.f32 %v380_v1, %v30_v54  ;;  %v102_v13 = vmul.f32 %v380_v1, %v31_v59  ;;  %v103_v14 = vmul.f32 %v380_v1, %v32_v60 }
  0x1d   :  { %v36_v6 = vld [vmem:[%s896_s0 + $0xb0] sm:$0xff]  ;;  %v104_v15 = vmul.f32 %v380_v1, %v33_v61  ;;  %v105_v17 = vmul.f32 %v380_v1, %v34_v4  ;;  %v106_v18 = vmul.f32 %v380_v1, %v35_v5 }
  0x1e   :  { %292 = vst [vmem:[%s899_s3 + $0x40] sm:$0xff] %v228_v55  ;;  %v172_v16 = vadd.f32 %v385_v2, %v101_v10  ;;  %v107_v19 = vmul.f32 %v380_v1, %v36_v6  ;;  %v173_v20 = vadd.f32 %v385_v2, %v102_v13  ;;  %v174_v21 = vadd.f32 %v385_v2, %v103_v14 }
  0x1f   :  { %v175_v22 = vadd.f32 %v385_v2, %v104_v15  ;;  %v176_v26 = vadd.f32 %v385_v2, %v105_v17  ;;  %v177_v27 = vadd.f32 %v385_v2, %v106_v18 }
  0x20   :  { %v236_v25 = vmax.f32 %v172_v16, 0.0  ;;  %v178_v28 = vadd.f32 %v385_v2, %v107_v19  ;;  %v237_v32 = vmax.f32 %v173_v20, 0.0  ;;  %v238_v33 = vmax.f32 %v174_v21, 0.0 }
  0x21   :  { %v239_v34 = vmax.f32 %v175_v22, 0.0  ;;  %v240_v39 = vmax.f32 %v176_v26, 0.0  ;;  %v241_v40 = vmax.f32 %v177_v27, 0.0 }
  0x22   :  { %v242_v41 = vmax.f32 %v178_v28, 0.0 }
  0x25   :  { %v37_v11 = vld [vmem:[%s896_s0 + $0xb8] sm:$0xff] }
  0x26   :  { %293 = vst [vmem:[%s899_s3 + $0x48] sm:$0xff] %v229_v62  ;;  %294 = vst [vmem:[%s899_s3 + $0x50] sm:$0xff] %v230_v63  ;;  %v108_v23 = vmul.f32 %v380_v1, %v37_v11 }
  0x27   :  { %295 = vst [vmem:[%s899_s3 + $0x58] sm:$0xff] %v231_v0  ;;  %296 = vst [vmem:[%s899_s3 + $0x60] sm:$0xff] %v232_v7 }
  0x28   :  { %297 = vst [vmem:[%s899_s3 + $0x68] sm:$0xff] %v233_v8  ;;  %298 = vst [vmem:[%s899_s3 + $0x70] sm:$0xff] %v234_v9  ;;  %v179_v35 = vadd.f32 %v385_v2, %v108_v23 }
  0x29   :  { %299 = vst [vmem:[%s899_s3 + $0x78] sm:$0xff] %v235_v12 }
  0x2a   :  { %v243_v44 = vmax.f32 %v179_v35, 0.0 }
  0x30   :  { %v38_v24 = vld [vmem:[%s896_s0 + $0xc0] sm:$0xff]  ;;  %v39_v29 = vld [vmem:[%s896_s0 + $0xc8] sm:$0xff]  ;;  %v40_v30 = vld [vmem:[%s896_s0 + $0xd0] sm:$0xff] }
  0x31   :  { %v41_v31 = vld [vmem:[%s896_s0 + $0xd8] sm:$0xff]  ;;  %v42_v36 = vld [vmem:[%s896_s0 + $0xe0] sm:$0xff]  ;;  %v43_v37 = vld [vmem:[%s896_s0 + $0xe8] sm:$0xff]  ;;  %v109_v42 = vmul.f32 %v380_v1, %v38_v24  ;;  %v110_v45 = vmul.f32 %v380_v1, %v39_v29  ;;  %v111_v46 = vmul.f32 %v380_v1, %v40_v30 }
  0x32   :  { %v44_v38 = vld [vmem:[%s896_s0 + $0xf0] sm:$0xff]  ;;  %v112_v47 = vmul.f32 %v380_v1, %v41_v31  ;;  %v113_v49 = vmul.f32 %v380_v1, %v42_v36  ;;  %v114_v50 = vmul.f32 %v380_v1, %v43_v37 }
  0x33   :  { %300 = vst [vmem:[%s899_s3 + $0x80] sm:$0xff] %v236_v25  ;;  %v180_v48 = vadd.f32 %v385_v2, %v109_v42  ;;  %v115_v51 = vmul.f32 %v380_v1, %v44_v38  ;;  %v181_v52 = vadd.f32 %v385_v2, %v110_v45  ;;  %v182_v53 = vadd.f32 %v385_v2, %v111_v46 }
  0x34   :  { %v183_v54 = vadd.f32 %v385_v2, %v112_v47  ;;  %v184_v58 = vadd.f32 %v385_v2, %v113_v49  ;;  %v185_v59 = vadd.f32 %v385_v2, %v114_v50 }
  0x35   :  { %v244_v57 = vmax.f32 %v180_v48, 0.0  ;;  %v186_v60 = vadd.f32 %v385_v2, %v115_v51  ;;  %v245_v0 = vmax.f32 %v181_v52, 0.0  ;;  %v246_v3 = vmax.f32 %v182_v53, 0.0 }
  0x36   :  { %v247_v4 = vmax.f32 %v183_v54, 0.0  ;;  %v248_v9 = vmax.f32 %v184_v58, 0.0  ;;  %v249_v10 = vmax.f32 %v185_v59, 0.0 }
  0x37   :  { %v250_v11 = vmax.f32 %v186_v60, 0.0 }
  0x3a   :  { %v45_v43 = vld [vmem:[%s896_s0 + $0xf8] sm:$0xff] }
  0x3b   :  { %301 = vst [vmem:[%s899_s3 + $0x88] sm:$0xff] %v237_v32  ;;  %302 = vst [vmem:[%s899_s3 + $0x90] sm:$0xff] %v238_v33  ;;  %v116_v55 = vmul.f32 %v380_v1, %v45_v43 }
  0x3c   :  { %303 = vst [vmem:[%s899_s3 + $0x98] sm:$0xff] %v239_v34  ;;  %304 = vst [vmem:[%s899_s3 + $0xa0] sm:$0xff] %v240_v39 }
  0x3d   :  { %305 = vst [vmem:[%s899_s3 + $0xa8] sm:$0xff] %v241_v40  ;;  %306 = vst [vmem:[%s899_s3 + $0xb0] sm:$0xff] %v242_v41  ;;  %v187_v5 = vadd.f32 %v385_v2, %v116_v55 }
  0x3e   :  { %307 = vst [vmem:[%s899_s3 + $0xb8] sm:$0xff] %v243_v44 }
  0x3f   :  { %v251_v14 = vmax.f32 %v187_v5, 0.0 }
  0x45   :  { %v46_v56 = vld [vmem:[%s896_s0 + $0x100] sm:$0xff]  ;;  %v47_v61 = vld [vmem:[%s896_s0 + $0x108] sm:$0xff]  ;;  %v48_v62 = vld [vmem:[%s896_s0 + $0x110] sm:$0xff] }
  0x46   :  { %v49_v63 = vld [vmem:[%s896_s0 + $0x118] sm:$0xff]  ;;  %v50_v6 = vld [vmem:[%s896_s0 + $0x120] sm:$0xff]  ;;  %v51_v7 = vld [vmem:[%s896_s0 + $0x128] sm:$0xff]  ;;  %v117_v12 = vmul.f32 %v380_v1, %v46_v56  ;;  %v118_v15 = vmul.f32 %v380_v1, %v47_v61  ;;  %v119_v16 = vmul.f32 %v380_v1, %v48_v62 }
  0x47   :  { %v52_v8 = vld [vmem:[%s896_s0 + $0x130] sm:$0xff]  ;;  %v120_v17 = vmul.f32 %v380_v1, %v49_v63  ;;  %v121_v19 = vmul.f32 %v380_v1, %v50_v6  ;;  %v122_v20 = vmul.f32 %v380_v1, %v51_v7 }
  0x48   :  { %308 = vst [vmem:[%s899_s3 + $0xc0] sm:$0xff] %v244_v57  ;;  %v188_v18 = vadd.f32 %v385_v2, %v117_v12  ;;  %v123_v21 = vmul.f32 %v380_v1, %v52_v8  ;;  %v189_v22 = vadd.f32 %v385_v2, %v118_v15  ;;  %v190_v23 = vadd.f32 %v385_v2, %v119_v16 }
  0x49   :  { %v191_v24 = vadd.f32 %v385_v2, %v120_v17  ;;  %v192_v28 = vadd.f32 %v385_v2, %v121_v19  ;;  %v193_v29 = vadd.f32 %v385_v2, %v122_v20 }
  0x4a   :  { %v252_v27 = vmax.f32 %v188_v18, 0.0  ;;  %v194_v30 = vadd.f32 %v385_v2, %v123_v21  ;;  %v253_v34 = vmax.f32 %v189_v22, 0.0  ;;  %v254_v35 = vmax.f32 %v190_v23, 0.0 }
  0x4b   :  { %v255_v36 = vmax.f32 %v191_v24, 0.0  ;;  %v256_v41 = vmax.f32 %v192_v28, 0.0  ;;  %v257_v42 = vmax.f32 %v193_v29, 0.0 }
  0x4c   :  { %v258_v43 = vmax.f32 %v194_v30, 0.0 }
  0x4f   :  { %v53_v13 = vld [vmem:[%s896_s0 + $0x138] sm:$0xff] }
  0x50   :  { %309 = vst [vmem:[%s899_s3 + $0xc8] sm:$0xff] %v245_v0  ;;  %310 = vst [vmem:[%s899_s3 + $0xd0] sm:$0xff] %v246_v3  ;;  %v124_v25 = vmul.f32 %v380_v1, %v53_v13 }
  0x51   :  { %311 = vst [vmem:[%s899_s3 + $0xd8] sm:$0xff] %v247_v4  ;;  %312 = vst [vmem:[%s899_s3 + $0xe0] sm:$0xff] %v248_v9 }
  0x52   :  { %313 = vst [vmem:[%s899_s3 + $0xe8] sm:$0xff] %v249_v10  ;;  %314 = vst [vmem:[%s899_s3 + $0xf0] sm:$0xff] %v250_v11  ;;  %v195_v37 = vadd.f32 %v385_v2, %v124_v25 }
  0x53   :  { %315 = vst [vmem:[%s899_s3 + $0xf8] sm:$0xff] %v251_v14 }
  0x54   :  { %v259_v46 = vmax.f32 %v195_v37, 0.0 }
  0x5a   :  { %v54_v26 = vld [vmem:[%s896_s0 + $0x140] sm:$0xff]  ;;  %v55_v31 = vld [vmem:[%s896_s0 + $0x148] sm:$0xff]  ;;  %v56_v32 = vld [vmem:[%s896_s0 + $0x150] sm:$0xff] }
  0x5b   :  { %v57_v33 = vld [vmem:[%s896_s0 + $0x158] sm:$0xff]  ;;  %v58_v38 = vld [vmem:[%s896_s0 + $0x160] sm:$0xff]  ;;  %v59_v39 = vld [vmem:[%s896_s0 + $0x168] sm:$0xff]  ;;  %v125_v44 = vmul.f32 %v380_v1, %v54_v26  ;;  %v126_v47 = vmul.f32 %v380_v1, %v55_v31  ;;  %v127_v48 = vmul.f32 %v380_v1, %v56_v32 }
  0x5c   :  { %v60_v40 = vld [vmem:[%s896_s0 + $0x170] sm:$0xff]  ;;  %v128_v49 = vmul.f32 %v380_v1, %v57_v33  ;;  %v129_v51 = vmul.f32 %v380_v1, %v58_v38  ;;  %v130_v52 = vmul.f32 %v380_v1, %v59_v39 }
  0x5d   :  { %316 = vst [vmem:[%s899_s3 + $0x100] sm:$0xff] %v252_v27  ;;  %v196_v50 = vadd.f32 %v385_v2, %v125_v44  ;;  %v131_v53 = vmul.f32 %v380_v1, %v60_v40  ;;  %v197_v54 = vadd.f32 %v385_v2, %v126_v47  ;;  %v198_v55 = vadd.f32 %v385_v2, %v127_v48 }
  0x5e   :  { %v199_v56 = vadd.f32 %v385_v2, %v128_v49  ;;  %v200_v60 = vadd.f32 %v385_v2, %v129_v51  ;;  %v201_v61 = vadd.f32 %v385_v2, %v130_v52 }
  0x5f   :  { %v260_v59 = vmax.f32 %v196_v50, 0.0  ;;  %v202_v62 = vadd.f32 %v385_v2, %v131_v53  ;;  %v261_v4 = vmax.f32 %v197_v54, 0.0  ;;  %v262_v5 = vmax.f32 %v198_v55, 0.0 }
  0x60   :  { %v263_v6 = vmax.f32 %v199_v56, 0.0  ;;  %v264_v11 = vmax.f32 %v200_v60, 0.0  ;;  %v265_v12 = vmax.f32 %v201_v61, 0.0 }
  0x61   :  { %v266_v13 = vmax.f32 %v202_v62, 0.0 }
  0x64   :  { %v61_v45 = vld [vmem:[%s896_s0 + $0x178] sm:$0xff] }
  0x65   :  { %317 = vst [vmem:[%s899_s3 + $0x108] sm:$0xff] %v253_v34  ;;  %318 = vst [vmem:[%s899_s3 + $0x110] sm:$0xff] %v254_v35  ;;  %v132_v57 = vmul.f32 %v380_v1, %v61_v45 }
  0x66   :  { %319 = vst [vmem:[%s899_s3 + $0x118] sm:$0xff] %v255_v36  ;;  %320 = vst [vmem:[%s899_s3 + $0x120] sm:$0xff] %v256_v41 }
  0x67   :  { %321 = vst [vmem:[%s899_s3 + $0x128] sm:$0xff] %v257_v42  ;;  %322 = vst [vmem:[%s899_s3 + $0x130] sm:$0xff] %v258_v43  ;;  %v203_v7 = vadd.f32 %v385_v2, %v132_v57 }
  0x68   :  { %323 = vst [vmem:[%s899_s3 + $0x138] sm:$0xff] %v259_v46 }
  0x69   :  { %v267_v16 = vmax.f32 %v203_v7, 0.0 }
  0x6f   :  { %v62_v58 = vld [vmem:[%s896_s0 + $0x180] sm:$0xff]  ;;  %v63_v63 = vld [vmem:[%s896_s0 + $0x188] sm:$0xff]  ;;  %v64_v0 = vld [vmem:[%s896_s0 + $0x190] sm:$0xff] }
  0x70   :  { %v65_v3 = vld [vmem:[%s896_s0 + $0x198] sm:$0xff]  ;;  %v66_v8 = vld [vmem:[%s896_s0 + $0x1a0] sm:$0xff]  ;;  %v67_v9 = vld [vmem:[%s896_s0 + $0x1a8] sm:$0xff]  ;;  %v133_v14 = vmul.f32 %v380_v1, %v62_v58  ;;  %v134_v17 = vmul.f32 %v380_v1, %v63_v63  ;;  %v135_v18 = vmul.f32 %v380_v1, %v64_v0 }
  0x71   :  { %v68_v10 = vld [vmem:[%s896_s0 + $0x1b0] sm:$0xff]  ;;  %v136_v19 = vmul.f32 %v380_v1, %v65_v3  ;;  %v137_v21 = vmul.f32 %v380_v1, %v66_v8  ;;  %v138_v22 = vmul.f32 %v380_v1, %v67_v9 }
  0x72   :  { %324 = vst [vmem:[%s899_s3 + $0x140] sm:$0xff] %v260_v59  ;;  %v204_v20 = vadd.f32 %v385_v2, %v133_v14  ;;  %v139_v23 = vmul.f32 %v380_v1, %v68_v10  ;;  %v205_v24 = vadd.f32 %v385_v2, %v134_v17  ;;  %v206_v25 = vadd.f32 %v385_v2, %v135_v18 }
  0x73   :  { %v207_v26 = vadd.f32 %v385_v2, %v136_v19  ;;  %v208_v30 = vadd.f32 %v385_v2, %v137_v21  ;;  %v209_v31 = vadd.f32 %v385_v2, %v138_v22 }
  0x74   :  { %v268_v29 = vmax.f32 %v204_v20, 0.0  ;;  %v210_v32 = vadd.f32 %v385_v2, %v139_v23  ;;  %v269_v36 = vmax.f32 %v205_v24, 0.0  ;;  %v270_v37 = vmax.f32 %v206_v25, 0.0 }
  0x75   :  { %v271_v38 = vmax.f32 %v207_v26, 0.0  ;;  %v272_v43 = vmax.f32 %v208_v30, 0.0  ;;  %v273_v44 = vmax.f32 %v209_v31, 0.0 }
  0x76   :  { %v274_v45 = vmax.f32 %v210_v32, 0.0 }
  0x79   :  { %v69_v15 = vld [vmem:[%s896_s0 + $0x1b8] sm:$0xff] }
  0x7a   :  { %325 = vst [vmem:[%s899_s3 + $0x148] sm:$0xff] %v261_v4  ;;  %326 = vst [vmem:[%s899_s3 + $0x150] sm:$0xff] %v262_v5  ;;  %v140_v27 = vmul.f32 %v380_v1, %v69_v15 }
  0x7b   :  { %327 = vst [vmem:[%s899_s3 + $0x158] sm:$0xff] %v263_v6  ;;  %328 = vst [vmem:[%s899_s3 + $0x160] sm:$0xff] %v264_v11 }
  0x7c   :  { %329 = vst [vmem:[%s899_s3 + $0x168] sm:$0xff] %v265_v12  ;;  %330 = vst [vmem:[%s899_s3 + $0x170] sm:$0xff] %v266_v13  ;;  %v211_v39 = vadd.f32 %v385_v2, %v140_v27 }
  0x7d   :  { %331 = vst [vmem:[%s899_s3 + $0x178] sm:$0xff] %v267_v16 }
  0x7e   :  { %v275_v48 = vmax.f32 %v211_v39, 0.0 }
  0x84   :  { %v70_v28 = vld [vmem:[%s896_s0 + $0x1c0] sm:$0xff]  ;;  %v71_v33 = vld [vmem:[%s896_s0 + $0x1c8] sm:$0xff]  ;;  %v72_v34 = vld [vmem:[%s896_s0 + $0x1d0] sm:$0xff] }
  0x85   :  { %v73_v35 = vld [vmem:[%s896_s0 + $0x1d8] sm:$0xff]  ;;  %v74_v40 = vld [vmem:[%s896_s0 + $0x1e0] sm:$0xff]  ;;  %v75_v41 = vld [vmem:[%s896_s0 + $0x1e8] sm:$0xff]  ;;  %v141_v46 = vmul.f32 %v380_v1, %v70_v28  ;;  %v142_v49 = vmul.f32 %v380_v1, %v71_v33  ;;  %v143_v50 = vmul.f32 %v380_v1, %v72_v34 }
  0x86   :  { %v76_v42 = vld [vmem:[%s896_s0 + $0x1f0] sm:$0xff]  ;;  %v144_v51 = vmul.f32 %v380_v1, %v73_v35  ;;  %v145_v53 = vmul.f32 %v380_v1, %v74_v40  ;;  %v146_v54 = vmul.f32 %v380_v1, %v75_v41 }
  0x87   :  { %332 = vst [vmem:[%s899_s3 + $0x180] sm:$0xff] %v268_v29  ;;  %v212_v52 = vadd.f32 %v385_v2, %v141_v46  ;;  %v147_v55 = vmul.f32 %v380_v1, %v76_v42  ;;  %v213_v56 = vadd.f32 %v385_v2, %v142_v49  ;;  %v214_v57 = vadd.f32 %v385_v2, %v143_v50 }
  0x88   :  { %v215_v58 = vadd.f32 %v385_v2, %v144_v51  ;;  %v216_v61 = vadd.f32 %v385_v2, %v145_v53  ;;  %v217_v62 = vadd.f32 %v385_v2, %v146_v54 }
  0x89   :  { %v276_v60 = vmax.f32 %v212_v52, 0.0  ;;  %v218_v63 = vadd.f32 %v385_v2, %v147_v55  ;;  %v277_v0 = vmax.f32 %v213_v56, 0.0  ;;  %v278_v3 = vmax.f32 %v214_v57, 0.0 }
  0x8a   :  { %v279_v4 = vmax.f32 %v215_v58, 0.0  ;;  %v280_v6 = vmax.f32 %v216_v61, 0.0  ;;  %v281_v7 = vmax.f32 %v217_v62, 0.0 }
  0x8b   :  { %v282_v8 = vmax.f32 %v218_v63, 0.0 }
  0x8e   :  { %v77_v47 = vld [vmem:[%s896_s0 + $0x1f8] sm:$0xff] }
  0x8f   :  { %333 = vst [vmem:[%s899_s3 + $0x188] sm:$0xff] %v269_v36  ;;  %334 = vst [vmem:[%s899_s3 + $0x190] sm:$0xff] %v270_v37  ;;  %v148_v59 = vmul.f32 %v380_v1, %v77_v47 }
  0x90   :  { %335 = vst [vmem:[%s899_s3 + $0x198] sm:$0xff] %v271_v38  ;;  %336 = vst [vmem:[%s899_s3 + $0x1a0] sm:$0xff] %v272_v43 }
  0x91   :  { %337 = vst [vmem:[%s899_s3 + $0x1a8] sm:$0xff] %v273_v44  ;;  %338 = vst [vmem:[%s899_s3 + $0x1b0] sm:$0xff] %v274_v45  ;;  %v219_v5 = vadd.f32 %v385_v2, %v148_v59 }
  0x92   :  { %339 = vst [vmem:[%s899_s3 + $0x1b8] sm:$0xff] %v275_v48  ;;  %340 = vst [vmem:[%s899_s3 + $0x1c0] sm:$0xff] %v276_v60 }
  0x93   :  { %341 = vst [vmem:[%s899_s3 + $0x1c8] sm:$0xff] %v277_v0  ;;  %342 = vst [vmem:[%s899_s3 + $0x1d0] sm:$0xff] %v278_v3  ;;  %v283_v1 = vmax.f32 %v219_v5, 0.0 }
  0x94   :  { %343 = vst [vmem:[%s899_s3 + $0x1d8] sm:$0xff] %v279_v4  ;;  %344 = vst [vmem:[%s899_s3 + $0x1e0] sm:$0xff] %v280_v6 }
  0x95   :  { %345 = vst [vmem:[%s899_s3 + $0x1e8] sm:$0xff] %v281_v7  ;;  %346 = vst [vmem:[%s899_s3 + $0x1f0] sm:$0xff] %v282_v8 }
  0x96   :  { %347 = vst [vmem:[%s899_s3 + $0x1f8] sm:$0xff] %v283_v1 }

// kernel: conv_bn_relu.2
= control target key start
LH: loop header
LB: loop body
LE: loop exit
PB: predicated region body
PF: predicated region fallthrough
CT: control target
= control target key end

     0   :  { %vm301_vm0 = vcmask 293888   ;;  %vm398_vm1 = vcmask 1041408   ;;  %v1219_v36 = vmov 0.0   ;;  %s1784_s1 = inlined_call_operand.vmem [shape: bf16[1,36,128], index: 1, kind: input, shape index: {}]   ;;  %s1785_s0 = inlined_call_operand.vmem [shape: bf16[1,512,36], index: 0, kind: input, shape index: {}]   ;;  %s1786_s3 = inlined_call_operand.vmem [shape: f32[1,8,128], index: 3, kind: output, shape index: {1}]   ;;  %s1787_s4 = inlined_call_operand.vmem [shape: f32[1,8,128], index: 4, kind: output, shape index: {2}]   ;;  %s1788_s2 = inlined_call_operand.vmem [shape: f32[1,512,128], index: 2, kind: output, shape index: {0}]  }
   0x1   :  { %v1184_v0 = vld [vmem:[%s1784_s1] sm:$0xff]   ;;  %v1185_v1 = vld [vmem:[%s1784_s1 + $0x8] sm:$0xff]   ;;  %v1186_v2 = vld [vmem:[%s1784_s1 + $0x10] ss:$0 sps:$4 sm:$0x33]   ;;  %55 = vst [vmem:[%s1786_s3] sm:$0xff] %v1219_v36 }
   0x2   :  { %1105 = vmatprep.subr.bf16.mxu0 %v1184_v0  ;;  %v1187_v3 = vld [vmem:[%s1785_s0] sm:$0xff]   ;;  %1175 = vmatprep.subr.bf16.mxu1 %v1184_v0  ;;  %v400_v4 = vsel %vm398_vm1, %v1186_v2, 0  ;;  %v1188_v5 = vld [vmem:[%s1785_s0 + $0x8] sm:$0xff]   ;;  %v1189_v6 = vld [vmem:[%s1785_s0 + $0x10] sm:$0xff]   ;;  %56 = vst [vmem:[%s1787_s4] sm:$0xff] %v1219_v36 }
   0x3   :  { %1106 = vmatpush3.bf16.msra.mxu0 %v1184_v0  ;;  %1178 = vmatpush3.bf16.msra.mxu1 %v1184_v0  ;;  %v1190_v7 = vld [vmem:[%s1785_s0 + $0x18] sm:$0xff]   ;;  %v1191_v8 = vld [vmem:[%s1785_s0 + $0x20] sm:$0xff]   ;;  %v1204_v10 = vld [vmem:[%s1785_s0 + $0x88] sm:$0xff]  }
   0x4   :  { %1107 = vmatprep.subr.bf16.mxu0 %v1185_v1  ;;  %1111 = vmatprep.mubr.msk.bf16.mxu0 %vm301_vm0, %v1187_v3  ;;  %v1203_v9 = vld [vmem:[%s1785_s0 + $0x80] sm:$0xff]   ;;  %v1205_v11 = vld [vmem:[%s1785_s0 + $0x90] sm:$0xff]   ;;  %v1192_v12 = vld [vmem:[%s1785_s0 + $0x28] sm:$0xff]  }
   0x5   :  { %1176 = vmatprep.subr.bf16.mxu1 %v1185_v1  ;;  %1143 = vmatprep.mubr.msk.bf16.mxu1 %vm301_vm0, %v1203_v9  ;;  %v1193_v13 = vld [vmem:[%s1785_s0 + $0x30] sm:$0xff]   ;;  %v1206_v14 = vld [vmem:[%s1785_s0 + $0x98] sm:$0xff]   ;;  %v1207_v15 = vld [vmem:[%s1785_s0 + $0xa0] sm:$0xff]  }
   0x6   :  { %v1194_v16 = vld [vmem:[%s1785_s0 + $0x38] sm:$0xff]   ;;  %v1208_v17 = vld [vmem:[%s1785_s0 + $0xa8] sm:$0xff]   ;;  %v1195_v18 = vld [vmem:[%s1785_s0 + $0x40] sm:$0xff]  }
   0x7   :  { %1108 = vmatpush3.bf16.msra.mxu0 %v1185_v1  ;;  %1179 = vmatpush3.bf16.msra.mxu1 %v1185_v1  ;;  %v1209_v19 = vld [vmem:[%s1785_s0 + $0xb0] sm:$0xff]   ;;  %v1196_v20 = vld [vmem:[%s1785_s0 + $0x48] sm:$0xff]   ;;  %v1210_v21 = vld [vmem:[%s1785_s0 + $0xb8] sm:$0xff]  }
   0x8   :  { %1181 = vmatprep.subr.msk.bf16.mxu0 %vm398_vm1, %v1186_v2  ;;  %1182 = vmatprep.subr.msk.bf16.mxu1 %vm398_vm1, %v1186_v2  ;;  %v1197_v22 = vld [vmem:[%s1785_s0 + $0x50] sm:$0xff]   ;;  %v1211_v23 = vld [vmem:[%s1785_s0 + $0xc0] sm:$0xff]   ;;  %v1198_v24 = vld [vmem:[%s1785_s0 + $0x58] sm:$0xff]  }
   0x9   :  { %v1212_v25 = vld [vmem:[%s1785_s0 + $0xc8] sm:$0xff]   ;;  %v1199_v26 = vld [vmem:[%s1785_s0 + $0x60] sm:$0xff]   ;;  %v1213_v27 = vld [vmem:[%s1785_s0 + $0xd0] sm:$0xff]  }
   0xa   :  { %v1200_v28 = vld [vmem:[%s1785_s0 + $0x68] sm:$0xff]   ;;  %v1214_v29 = vld [vmem:[%s1785_s0 + $0xd8] sm:$0xff]   ;;  %v1201_v30 = vld [vmem:[%s1785_s0 + $0x70] sm:$0xff]  }
   0xb   :  { %1110 = vmatpush3.bf16.msra.mxu0 %v400_v4  ;;  %1180 = vmatpush3.bf16.msra.mxu1 %v400_v4  ;;  %v1215_v31 = vld [vmem:[%s1785_s0 + $0xe0] sm:$0xff]   ;;  %v1202_v32 = vld [vmem:[%s1785_s0 + $0x78] sm:$0xff]   ;;  %v1216_v33 = vld [vmem:[%s1785_s0 + $0xe8] sm:$0xff]  }
   0xc   :  { %v1217_v34 = vld [vmem:[%s1785_s0 + $0xf0] sm:$0xff]   ;;  %v1218_v35 = vld [vmem:[%s1785_s0 + $0xf8] sm:$0xff]  }
   0xe   :  { %1112 = vmatmul.mubr.msk.bf16.vlgmr.msra.gmra.mrb[0].mxu0 %vm301_vm0, %v1188_v5  ;;  %1144 = vmatmul.mubr.msk.bf16.vlgmr.msra.gmra.mrb[0].mxu1 %vm301_vm0, %v1204_v10 }
   0xf   :  { %1115 = vmatprep.mubr.msk.bf16.mxu0 %vm301_vm0, %v1189_v6  ;;  %1147 = vmatprep.mubr.msk.bf16.mxu1 %vm301_vm0, %v1205_v11 }
  0x16   :  { %1116 = vmatmul.mubr.msk.bf16.gmra.mrb[4].mxu0 %vm301_vm0, %v1190_v7  ;;  %1148 = vmatmul.mubr.msk.bf16.gmra.mrb[4].mxu1 %vm301_vm0, %v1206_v14 }
  0x17   :  { %1119 = vmatprep.mubr.msk.bf16.mxu0 %vm301_vm0, %v1191_v8  ;;  %1151 = vmatprep.mubr.msk.bf16.mxu1 %vm301_vm0, %v1207_v15 }
  0x1e   :  { %1120 = vmatmul.mubr.msk.bf16.gmra.mrb[8].mxu0 %vm301_vm0, %v1192_v12  ;;  %1152 = vmatmul.mubr.msk.bf16.gmra.mrb[8].mxu1 %vm301_vm0, %v1208_v17 }
  0x1f   :  { %1123 = vmatprep.mubr.msk.bf16.mxu0 %vm301_vm0, %v1193_v13  ;;  %1155 = vmatprep.mubr.msk.bf16.mxu1 %vm301_vm0, %v1209_v19 }
  0x26   :  { %1124 = vmatmul.mubr.msk.bf16.gmra.mrb[12].mxu0 %vm301_vm0, %v1194_v16  ;;  %1156 = vmatmul.mubr.msk.bf16.gmra.mrb[12].mxu1 %vm301_vm0, %v1210_v21 }
  0x27   :  { %1127 = vmatprep.mubr.msk.bf16.mxu0 %vm301_vm0, %v1195_v18  ;;  %1159 = vmatprep.mubr.msk.bf16.mxu1 %vm301_vm0, %v1211_v23 }
  0x2e   :  { %1128 = vmatmul.mubr.msk.bf16.gmra.mrb[16].mxu0 %vm301_vm0, %v1196_v20  ;;  %1160 = vmatmul.mubr.msk.bf16.gmra.mrb[16].mxu1 %vm301_vm0, %v1212_v25 }
  0x2f   :  { %1131 = vmatprep.mubr.msk.bf16.mxu0 %vm301_vm0, %v1197_v22  ;;  %1163 = vmatprep.mubr.msk.bf16.mxu1 %vm301_vm0, %v1213_v27 }
  0x36   :  { %1132 = vmatmul.mubr.msk.bf16.gmra.mrb[20].mxu0 %vm301_vm0, %v1198_v24  ;;  %1164 = vmatmul.mubr.msk.bf16.gmra.mrb[20].mxu1 %vm301_vm0, %v1214_v29 }
  0x37   :  { %1135 = vmatprep.mubr.msk.bf16.mxu0 %vm301_vm0, %v1199_v26  ;;  %1167 = vmatprep.mubr.msk.bf16.mxu1 %vm301_vm0, %v1215_v31 }
  0x3e   :  { %1136 = vmatmul.mubr.msk.bf16.gmra.mrb[24].mxu0 %vm301_vm0, %v1200_v28  ;;  %1168 = vmatmul.mubr.msk.bf16.gmra.mrb[24].mxu1 %vm301_vm0, %v1216_v33 }
  0x3f   :  { %1139 = vmatprep.mubr.msk.bf16.mxu0 %vm301_vm0, %v1201_v30  ;;  %1171 = vmatprep.mubr.msk.bf16.mxu1 %vm301_vm0, %v1217_v34 }
  0x46   :  { %1140 = vmatmul.mubr.msk.bf16.gmra.mrb[28].mxu0 %vm301_vm0, %v1202_v32  ;;  %1172 = vmatmul.mubr.msk.bf16.gmra.mrb[28].mxu1 %vm301_vm0, %v1218_v35 }
  0xe1   :  { %v1113_v37 = vpop.f32.mrb[0].mxu0  ;;  %v1400_v51 = vpop.f32.mrb[0].mxu1 }
  0xe2   :  { %693 = vst [vmem:[%s1788_s2 + $0x10] sm:$0xff] %v1113_v37  ;;  %v436_v38 = vpop.f32.mrb[1].mxu0  ;;  %v830_v44 = vmul.f32 %v1113_v37, %v1113_v37  ;;  %725 = vst [vmem:[%s1788_s2 + $0x110] sm:$0xff] %v1400_v51  ;;  %v1409_v53 = vpop.f32.mrb[1].mxu1 }
  0xe3   :  { %691 = vst [vmem:[%s1788_s2] sm:$0xff] %v436_v38  ;;  %v1114_v39 = vpop.f32.mrb[2].mxu0  ;;  %v828_v41 = vmul.f32 %v436_v38, %v436_v38  ;;  %723 = vst [vmem:[%s1788_s2 + $0x100] sm:$0xff] %v1409_v53  ;;  %v1418_v58 = vpop.f32.mrb[2].mxu1 }
  0xe4   :  { %694 = vst [vmem:[%s1788_s2 + $0x18] sm:$0xff] %v1114_v39  ;;  %v439_v40 = vpop.f32.mrb[3].mxu0  ;;  %v831_v47 = vmul.f32 %v1114_v39, %v1114_v39  ;;  %726 = vst [vmem:[%s1788_s2 + $0x118] sm:$0xff] %v1418_v58  ;;  %v1427_v60 = vpop.f32.mrb[3].mxu1 }
  0xe5   :  { %692 = vst [vmem:[%s1788_s2 + $0x8] sm:$0xff] %v439_v40  ;;  %v756_v42 = vadd.f32 %v439_v40, %v436_v38  ;;  %v829_v43 = vmul.f32 %v439_v40, %v439_v40  ;;  %724 = vst [vmem:[%s1788_s2 + $0x108] sm:$0xff] %v1427_v60 }
  0xe7   :  { %v757_v45 = vadd.f32 %v1113_v37, %v756_v42  ;;  %v892_v46 = vadd.f32 %v829_v43, %v828_v41 }
  0xe9   :  { %v893_v48 = vadd.f32 %v892_v46, %v830_v44  ;;  %v1117_v49 = vpop.f32.mrb[4].mxu0  ;;  %v758_v50 = vadd.f32 %v1114_v39, %v757_v45  ;;  %v1436_v7 = vpop.f32.mrb[4].mxu1 }
  0xea   :  { %697 = vst [vmem:[%s1788_s2 + $0x30] sm:$0xff] %v1117_v49  ;;  %v452_v52 = vpop.f32.mrb[5].mxu0  ;;  %v834_v0 = vmul.f32 %v1117_v49, %v1117_v49  ;;  %729 = vst [vmem:[%s1788_s2 + $0x130] sm:$0xff] %v1436_v7  ;;  %v1445_v9 = vpop.f32.mrb[5].mxu1 }
  0xeb   :  { %695 = vst [vmem:[%s1788_s2 + $0x20] sm:$0xff] %v452_v52  ;;  %v759_v54 = vadd.f32 %v758_v50, %v452_v52  ;;  %v832_v55 = vmul.f32 %v452_v52, %v452_v52  ;;  %v894_v56 = vadd.f32 %v893_v48, %v831_v47  ;;  %v1118_v57 = vpop.f32.mrb[6].mxu0  ;;  %727 = vst [vmem:[%s1788_s2 + $0x120] sm:$0xff] %v1445_v9  ;;  %v1454_v14 = vpop.f32.mrb[6].mxu1 }
  0xec   :  { %698 = vst [vmem:[%s1788_s2 + $0x38] sm:$0xff] %v1118_v57  ;;  %v455_v59 = vpop.f32.mrb[7].mxu0  ;;  %v835_v3 = vmul.f32 %v1118_v57, %v1118_v57  ;;  %730 = vst [vmem:[%s1788_s2 + $0x138] sm:$0xff] %v1454_v14  ;;  %v1463_v16 = vpop.f32.mrb[7].mxu1 }
  0xed   :  { %v895_v61 = vadd.f32 %v894_v56, %v832_v55  ;;  %696 = vst [vmem:[%s1788_s2 + $0x28] sm:$0xff] %v455_v59  ;;  %v760_v62 = vadd.f32 %v759_v54, %v455_v59  ;;  %v833_v63 = vmul.f32 %v455_v59, %v455_v59  ;;  %728 = vst [vmem:[%s1788_s2 + $0x128] sm:$0xff] %v1463_v16 }
  0xef   :  { %v761_v1 = vadd.f32 %v1117_v49, %v760_v62  ;;  %v896_v2 = vadd.f32 %v895_v61, %v833_v63 }
  0xf1   :  { %v897_v4 = vadd.f32 %v896_v2, %v834_v0  ;;  %v1121_v5 = vpop.f32.mrb[8].mxu0  ;;  %v762_v6 = vadd.f32 %v1118_v57, %v761_v1  ;;  %v1472_v27 = vpop.f32.mrb[8].mxu1 }
  0xf2   :  { %701 = vst [vmem:[%s1788_s2 + $0x50] sm:$0xff] %v1121_v5  ;;  %v468_v8 = vpop.f32.mrb[9].mxu0  ;;  %v838_v20 = vmul.f32 %v1121_v5, %v1121_v5  ;;  %733 = vst [vmem:[%s1788_s2 + $0x150] sm:$0xff] %v1472_v27  ;;  %v1481_v29 = vpop.f32.mrb[9].mxu1 }
  0xf3   :  { %699 = vst [vmem:[%s1788_s2 + $0x40] sm:$0xff] %v468_v8  ;;  %v763_v10 = vadd.f32 %v762_v6, %v468_v8  ;;  %v836_v11 = vmul.f32 %v468_v8, %v468_v8  ;;  %v898_v12 = vadd.f32 %v897_v4, %v835_v3  ;;  %v1122_v13 = vpop.f32.mrb[10].mxu0  ;;  %731 = vst [vmem:[%s1788_s2 + $0x140] sm:$0xff] %v1481_v29  ;;  %v1490_v34 = vpop.f32.mrb[10].mxu1 }
  0xf4   :  { %702 = vst [vmem:[%s1788_s2 + $0x58] sm:$0xff] %v1122_v13  ;;  %v471_v15 = vpop.f32.mrb[11].mxu0  ;;  %v839_v23 = vmul.f32 %v1122_v13, %v1122_v13  ;;  %734 = vst [vmem:[%s1788_s2 + $0x158] sm:$0xff] %v1490_v34  ;;  %v1499_v36 = vpop.f32.mrb[11].mxu1 }
  0xf5   :  { %v899_v17 = vadd.f32 %v898_v12, %v836_v11  ;;  %700 = vst [vmem:[%s1788_s2 + $0x48] sm:$0xff] %v471_v15  ;;  %v764_v18 = vadd.f32 %v763_v10, %v471_v15  ;;  %v837_v19 = vmul.f32 %v471_v15, %v471_v15  ;;  %732 = vst [vmem:[%s1788_s2 + $0x148] sm:$0xff] %v1499_v36 }
  0xf7   :  { %v765_v21 = vadd.f32 %v1121_v5, %v764_v18  ;;  %v900_v22 = vadd.f32 %v899_v17, %v837_v19 }
  0xf9   :  { %v901_v24 = vadd.f32 %v900_v22, %v838_v20  ;;  %v1125_v25 = vpop.f32.mrb[12].mxu0  ;;  %v766_v26 = vadd.f32 %v1122_v13, %v765_v21  ;;  %v1508_v47 = vpop.f32.mrb[12].mxu1 }
  0xfa   :  { %705 = vst [vmem:[%s1788_s2 + $0x70] sm:$0xff] %v1125_v25  ;;  %v484_v28 = vpop.f32.mrb[13].mxu0  ;;  %v842_v40 = vmul.f32 %v1125_v25, %v1125_v25  ;;  %737 = vst [vmem:[%s1788_s2 + $0x170] sm:$0xff] %v1508_v47  ;;  %v1517_v49 = vpop.f32.mrb[13].mxu1 }
  0xfb   :  { %703 = vst [vmem:[%s1788_s2 + $0x60] sm:$0xff] %v484_v28  ;;  %v767_v30 = vadd.f32 %v766_v26, %v484_v28  ;;  %v840_v31 = vmul.f32 %v484_v28, %v484_v28  ;;  %v902_v32 = vadd.f32 %v901_v24, %v839_v23  ;;  %v1126_v33 = vpop.f32.mrb[14].mxu0  ;;  %735 = vst [vmem:[%s1788_s2 + $0x160] sm:$0xff] %v1517_v49  ;;  %v1526_v56 = vpop.f32.mrb[14].mxu1 }
  0xfc   :  { %706 = vst [vmem:[%s1788_s2 + $0x78] sm:$0xff] %v1126_v33  ;;  %v487_v35 = vpop.f32.mrb[15].mxu0  ;;  %v843_v43 = vmul.f32 %v1126_v33, %v1126_v33  ;;  %738 = vst [vmem:[%s1788_s2 + $0x178] sm:$0xff] %v1526_v56  ;;  %v1535_v59 = vpop.f32.mrb[15].mxu1 }
  0xfd   :  { %v903_v37 = vadd.f32 %v902_v32, %v840_v31  ;;  %704 = vst [vmem:[%s1788_s2 + $0x68] sm:$0xff] %v487_v35  ;;  %v768_v38 = vadd.f32 %v767_v30, %v487_v35  ;;  %v841_v39 = vmul.f32 %v487_v35, %v487_v35  ;;  %736 = vst [vmem:[%s1788_s2 + $0x168] sm:$0xff] %v1535_v59 }
  0xff   :  { %v769_v41 = vadd.f32 %v1125_v25, %v768_v38  ;;  %v904_v42 = vadd.f32 %v903_v37, %v841_v39 }
 0x101   :  { %v905_v44 = vadd.f32 %v904_v42, %v842_v40  ;;  %v1129_v45 = vpop.f32.mrb[16].mxu0  ;;  %v770_v46 = vadd.f32 %v1126_v33, %v769_v41  ;;  %v1544_v8 = vpop.f32.mrb[16].mxu1 }
 0x102   :  { %709 = vst [vmem:[%s1788_s2 + $0x90] sm:$0xff] %v1129_v45  ;;  %v500_v48 = vpop.f32.mrb[17].mxu0  ;;  %v846_v0 = vmul.f32 %v1129_v45, %v1129_v45  ;;  %741 = vst [vmem:[%s1788_s2 + $0x190] sm:$0xff] %v1544_v8  ;;  %v1553_v11 = vpop.f32.mrb[17].mxu1 }
 0x103   :  { %707 = vst [vmem:[%s1788_s2 + $0x80] sm:$0xff] %v500_v48  ;;  %v771_v50 = vadd.f32 %v770_v46, %v500_v48  ;;  %v844_v52 = vmul.f32 %v500_v48, %v500_v48  ;;  %v906_v54 = vadd.f32 %v905_v44, %v843_v43  ;;  %v1130_v55 = vpop.f32.mrb[18].mxu0  ;;  %739 = vst [vmem:[%s1788_s2 + $0x180] sm:$0xff] %v1553_v11  ;;  %v1562_v18 = vpop.f32.mrb[18].mxu1 }
 0x104   :  { %710 = vst [vmem:[%s1788_s2 + $0x98] sm:$0xff] %v1130_v55  ;;  %v503_v57 = vpop.f32.mrb[19].mxu0  ;;  %v847_v3 = vmul.f32 %v1130_v55, %v1130_v55  ;;  %742 = vst [vmem:[%s1788_s2 + $0x198] sm:$0xff] %v1562_v18  ;;  %v1571_v20 = vpop.f32.mrb[19].mxu1 }
 0x105   :  { %v907_v61 = vadd.f32 %v906_v54, %v844_v52  ;;  %708 = vst [vmem:[%s1788_s2 + $0x88] sm:$0xff] %v503_v57  ;;  %v772_v62 = vadd.f32 %v771_v50, %v503_v57  ;;  %v845_v63 = vmul.f32 %v503_v57, %v503_v57  ;;  %740 = vst [vmem:[%s1788_s2 + $0x188] sm:$0xff] %v1571_v20 }
 0x107   :  { %v773_v1 = vadd.f32 %v1129_v45, %v772_v62  ;;  %v908_v2 = vadd.f32 %v907_v61, %v845_v63 }
 0x109   :  { %v909_v4 = vadd.f32 %v908_v2, %v846_v0  ;;  %v1133_v5 = vpop.f32.mrb[20].mxu0  ;;  %v774_v6 = vadd.f32 %v1130_v55, %v773_v1  ;;  %v1580_v33 = vpop.f32.mrb[20].mxu1 }
 0x10a   :  { %713 = vst [vmem:[%s1788_s2 + $0xb0] sm:$0xff] %v1133_v5  ;;  %v516_v10 = vpop.f32.mrb[21].mxu0  ;;  %v850_v24 = vmul.f32 %v1133_v5, %v1133_v5  ;;  %745 = vst [vmem:[%s1788_s2 + $0x1b0] sm:$0xff] %v1580_v33  ;;  %v1589_v37 = vpop.f32.mrb[21].mxu1 }
 0x10b   :  { %711 = vst [vmem:[%s1788_s2 + $0xa0] sm:$0xff] %v516_v10  ;;  %v775_v12 = vadd.f32 %v774_v6, %v516_v10  ;;  %v848_v13 = vmul.f32 %v516_v10, %v516_v10  ;;  %v910_v15 = vadd.f32 %v909_v4, %v847_v3  ;;  %v1134_v17 = vpop.f32.mrb[22].mxu0  ;;  %743 = vst [vmem:[%s1788_s2 + $0x1a0] sm:$0xff] %v1589_v37  ;;  %v1598_v42 = vpop.f32.mrb[22].mxu1 }
 0x10c   :  { %714 = vst [vmem:[%s1788_s2 + $0xb8] sm:$0xff] %v1134_v17  ;;  %v519_v19 = vpop.f32.mrb[23].mxu0  ;;  %v851_v28 = vmul.f32 %v1134_v17, %v1134_v17  ;;  %746 = vst [vmem:[%s1788_s2 + $0x1b8] sm:$0xff] %v1598_v42  ;;  %v1607_v44 = vpop.f32.mrb[23].mxu1 }
 0x10d   :  { %v911_v21 = vadd.f32 %v910_v15, %v848_v13  ;;  %712 = vst [vmem:[%s1788_s2 + $0xa8] sm:$0xff] %v519_v19  ;;  %v776_v22 = vadd.f32 %v775_v12, %v519_v19  ;;  %v849_v23 = vmul.f32 %v519_v19, %v519_v19  ;;  %744 = vst [vmem:[%s1788_s2 + $0x1a8] sm:$0xff] %v1607_v44 }
 0x10f   :  { %v777_v25 = vadd.f32 %v1133_v5, %v776_v22  ;;  %v912_v26 = vadd.f32 %v911_v21, %v849_v23 }
 0x111   :  { %v913_v30 = vadd.f32 %v912_v26, %v850_v24  ;;  %v1137_v31 = vpop.f32.mrb[24].mxu0  ;;  %v778_v32 = vadd.f32 %v1134_v17, %v777_v25  ;;  %v1616_v63 = vpop.f32.mrb[24].mxu1  ;;  %v860_v26 = vmul.f32 %v1409_v53, %v1409_v53 }
 0x112   :  { %717 = vst [vmem:[%s1788_s2 + $0xd0] sm:$0xff] %v1137_v31  ;;  %v532_v35 = vpop.f32.mrb[25].mxu0  ;;  %v854_v50 = vmul.f32 %v1137_v31, %v1137_v31  ;;  %749 = vst [vmem:[%s1788_s2 + $0x1d0] sm:$0xff] %v1616_v63  ;;  %v1625_v1 = vpop.f32.mrb[25].mxu1 }
 0x113   :  { %715 = vst [vmem:[%s1788_s2 + $0xc0] sm:$0xff] %v532_v35  ;;  %v779_v38 = vadd.f32 %v778_v32, %v532_v35  ;;  %v852_v39 = vmul.f32 %v532_v35, %v532_v35  ;;  %v914_v40 = vadd.f32 %v913_v30, %v851_v28  ;;  %v1138_v41 = vpop.f32.mrb[26].mxu0  ;;  %747 = vst [vmem:[%s1788_s2 + $0x1c0] sm:$0xff] %v1625_v1  ;;  %v1634_v6 = vpop.f32.mrb[26].mxu1 }
 0x114   :  { %718 = vst [vmem:[%s1788_s2 + $0xd8] sm:$0xff] %v1138_v41  ;;  %v535_v43 = vpop.f32.mrb[27].mxu0  ;;  %v855_v55 = vmul.f32 %v1138_v41, %v1138_v41  ;;  %750 = vst [vmem:[%s1788_s2 + $0x1d8] sm:$0xff] %v1634_v6  ;;  %v1643_v12 = vpop.f32.mrb[27].mxu1 }
 0x115   :  { %v915_v45 = vadd.f32 %v914_v40, %v852_v39  ;;  %716 = vst [vmem:[%s1788_s2 + $0xc8] sm:$0xff] %v535_v43  ;;  %v780_v46 = vadd.f32 %v779_v38, %v535_v43  ;;  %v853_v48 = vmul.f32 %v535_v43, %v535_v43  ;;  %748 = vst [vmem:[%s1788_s2 + $0x1c8] sm:$0xff] %v1643_v12 }
 0x117   :  { %v781_v52 = vadd.f32 %v1137_v31, %v780_v46  ;;  %v916_v54 = vadd.f32 %v915_v45, %v853_v48  ;;  %v863_v46 = vmul.f32 %v1418_v58, %v1418_v58 }
 0x119   :  { %v917_v57 = vadd.f32 %v916_v54, %v854_v50  ;;  %v1141_v61 = vpop.f32.mrb[28].mxu0  ;;  %v782_v62 = vadd.f32 %v1138_v41, %v781_v52  ;;  %v1654_v28 = vpop.f32.mrb[28].mxu1  ;;  %v862_v41 = vmul.f32 %v1400_v51, %v1400_v51 }
 0x11a   :  { %721 = vst [vmem:[%s1788_s2 + $0xf0] sm:$0xff] %v1141_v61  ;;  %v548_v0 = vpop.f32.mrb[29].mxu0  ;;  %v858_v19 = vmul.f32 %v1141_v61, %v1141_v61  ;;  %753 = vst [vmem:[%s1788_s2 + $0x1f0] sm:$0xff] %v1654_v28  ;;  %v1660_v30 = vpop.f32.mrb[29].mxu1 }
 0x11b   :  { %719 = vst [vmem:[%s1788_s2 + $0xe0] sm:$0xff] %v548_v0  ;;  %v783_v2 = vadd.f32 %v782_v62, %v548_v0  ;;  %v856_v3 = vmul.f32 %v548_v0, %v548_v0  ;;  %v918_v4 = vadd.f32 %v917_v57, %v855_v55  ;;  %v1142_v5 = vpop.f32.mrb[30].mxu0  ;;  %751 = vst [vmem:[%s1788_s2 + $0x1e0] sm:$0xff] %v1660_v30  ;;  %v1667_v35 = vpop.f32.mrb[30].mxu1 }
 0x11c   :  { %722 = vst [vmem:[%s1788_s2 + $0xf8] sm:$0xff] %v1142_v5  ;;  %v551_v10 = vpop.f32.mrb[31].mxu0  ;;  %v859_v23 = vmul.f32 %v1142_v5, %v1142_v5  ;;  %754 = vst [vmem:[%s1788_s2 + $0x1f8] sm:$0xff] %v1667_v35  ;;  %v1673_v38 = vpop.f32.mrb[31].mxu1 }
 0x11d   :  { %v919_v13 = vadd.f32 %v918_v4, %v856_v3  ;;  %720 = vst [vmem:[%s1788_s2 + $0xe8] sm:$0xff] %v551_v10  ;;  %v784_v15 = vadd.f32 %v783_v2, %v551_v10  ;;  %v857_v17 = vmul.f32 %v551_v10, %v551_v10  ;;  %752 = vst [vmem:[%s1788_s2 + $0x1e8] sm:$0xff] %v1673_v38 }
 0x11f   :  { %v785_v21 = vadd.f32 %v1141_v61, %v784_v15  ;;  %v920_v22 = vadd.f32 %v919_v13, %v857_v17  ;;  %v865_v61 = vmul.f32 %v1463_v16, %v1463_v16  ;;  %v869_v13 = vmul.f32 %v1499_v36, %v1499_v36 }
 0x121   :  { %v921_v24 = vadd.f32 %v920_v22, %v858_v19  ;;  %v786_v25 = vadd.f32 %v1142_v5, %v785_v21 }
 0x123   :  { %v787_v31 = vadd.f32 %v786_v25, %v1409_v53  ;;  %v922_v32 = vadd.f32 %v921_v24, %v859_v23  ;;  %v861_v53 = vmul.f32 %v1427_v60, %v1427_v60  ;;  %v873_v25 = vmul.f32 %v1535_v59, %v1535_v59 }
 0x125   :  { %v923_v39 = vadd.f32 %v922_v32, %v860_v26  ;;  %v788_v40 = vadd.f32 %v787_v31, %v1427_v60  ;;  %v864_v60 = vmul.f32 %v1445_v9, %v1445_v9 }
 0x127   :  { %v789_v43 = vadd.f32 %v1400_v51, %v788_v40  ;;  %v924_v45 = vadd.f32 %v923_v39, %v861_v53  ;;  %v866_v51 = vmul.f32 %v1436_v7, %v1436_v7 }
 0x129   :  { %v925_v48 = vadd.f32 %v924_v45, %v862_v41  ;;  %v790_v50 = vadd.f32 %v1418_v58, %v789_v43  ;;  %v867_v58 = vmul.f32 %v1454_v14, %v1454_v14  ;;  %v877_v43 = vmul.f32 %v1571_v20, %v1571_v20 }
 0x12b   :  { %v791_v52 = vadd.f32 %v790_v50, %v1445_v9  ;;  %v926_v54 = vadd.f32 %v925_v48, %v863_v46  ;;  %v868_v9 = vmul.f32 %v1481_v29, %v1481_v29 }
 0x12d   :  { %v927_v55 = vadd.f32 %v926_v54, %v864_v60  ;;  %v792_v57 = vadd.f32 %v791_v52, %v1463_v16 }
 0x12f   :  { %v793_v62 = vadd.f32 %v1436_v7, %v792_v57  ;;  %v928_v0 = vadd.f32 %v927_v55, %v865_v61  ;;  %v870_v7 = vmul.f32 %v1472_v27, %v1472_v27  ;;  %v881_v55 = vmul.f32 %v1607_v44, %v1607_v44 }
 0x131   :  { %v929_v2 = vadd.f32 %v928_v0, %v866_v51  ;;  %v794_v3 = vadd.f32 %v1454_v14, %v793_v62  ;;  %v871_v14 = vmul.f32 %v1490_v34, %v1490_v34 }
 0x133   :  { %v795_v4 = vadd.f32 %v794_v3, %v1481_v29  ;;  %v930_v5 = vadd.f32 %v929_v2, %v867_v58  ;;  %v872_v29 = vmul.f32 %v1517_v49, %v1517_v49  ;;  %v885_v3 = vmul.f32 %v1643_v12, %v1643_v12 }
 0x135   :  { %v931_v10 = vadd.f32 %v930_v5, %v868_v9  ;;  %v796_v16 = vadd.f32 %v795_v4, %v1499_v36 }
 0x137   :  { %v797_v15 = vadd.f32 %v1472_v27, %v796_v16  ;;  %v932_v17 = vadd.f32 %v931_v10, %v869_v13  ;;  %v874_v27 = vmul.f32 %v1508_v47, %v1508_v47 }
 0x139   :  { %v933_v19 = vadd.f32 %v932_v17, %v870_v7  ;;  %v798_v21 = vadd.f32 %v1490_v34, %v797_v15  ;;  %v875_v34 = vmul.f32 %v1526_v56, %v1526_v56  ;;  %v889_v15 = vmul.f32 %v1673_v38, %v1673_v38 }
 0x13b   :  { %v799_v22 = vadd.f32 %v798_v21, %v1517_v49  ;;  %v934_v23 = vadd.f32 %v933_v19, %v871_v14  ;;  %v876_v49 = vmul.f32 %v1553_v11, %v1553_v11 }
 0x13d   :  { %v935_v24 = vadd.f32 %v934_v23, %v872_v29  ;;  %v800_v36 = vadd.f32 %v799_v22, %v1535_v59 }
 0x13f   :  { %v801_v26 = vadd.f32 %v1508_v47, %v800_v36  ;;  %v936_v31 = vadd.f32 %v935_v24, %v873_v25  ;;  %v878_v47 = vmul.f32 %v1544_v8, %v1544_v8 }
 0x141   :  { %v937_v32 = vadd.f32 %v936_v31, %v874_v27  ;;  %v802_v39 = vadd.f32 %v1526_v56, %v801_v26  ;;  %v879_v56 = vmul.f32 %v1562_v18, %v1562_v18 }
 0x143   :  { %v803_v40 = vadd.f32 %v802_v39, %v1553_v11  ;;  %v938_v53 = vadd.f32 %v937_v32, %v875_v34  ;;  %v880_v11 = vmul.f32 %v1589_v37, %v1589_v37 }
 0x145   :  { %v939_v41 = vadd.f32 %v938_v53, %v876_v49  ;;  %v804_v59 = vadd.f32 %v803_v40, %v1571_v20 }
 0x147   :  { %v805_v45 = vadd.f32 %v1544_v8, %v804_v59  ;;  %v940_v46 = vadd.f32 %v939_v41, %v877_v43  ;;  %v882_v8 = vmul.f32 %v1580_v33, %v1580_v33 }
 0x149   :  { %v941_v48 = vadd.f32 %v940_v46, %v878_v47  ;;  %v806_v50 = vadd.f32 %v1562_v18, %v805_v45  ;;  %v883_v18 = vmul.f32 %v1598_v42, %v1598_v42 }
 0x14b   :  { %v807_v60 = vadd.f32 %v806_v50, %v1589_v37  ;;  %v942_v52 = vadd.f32 %v941_v48, %v879_v56  ;;  %v884_v37 = vmul.f32 %v1625_v1, %v1625_v1 }
 0x14d   :  { %v943_v54 = vadd.f32 %v942_v52, %v880_v11  ;;  %v808_v20 = vadd.f32 %v807_v60, %v1607_v44 }
 0x14f   :  { %v809_v57 = vadd.f32 %v1580_v33, %v808_v20  ;;  %v944_v61 = vadd.f32 %v943_v54, %v881_v55  ;;  %v886_v33 = vmul.f32 %v1616_v63, %v1616_v63 }
 0x151   :  { %v945_v51 = vadd.f32 %v944_v61, %v882_v8  ;;  %v810_v62 = vadd.f32 %v1598_v42, %v809_v57  ;;  %v887_v42 = vmul.f32 %v1634_v6, %v1634_v6 }
 0x153   :  { %v811_v0 = vadd.f32 %v810_v62, %v1625_v1  ;;  %v946_v58 = vadd.f32 %v945_v51, %v883_v18  ;;  %v888_v1 = vmul.f32 %v1660_v30, %v1660_v30 }
 0x155   :  { %v947_v2 = vadd.f32 %v946_v58, %v884_v37  ;;  %v812_v44 = vadd.f32 %v811_v0, %v1643_v12 }
 0x157   :  { %v813_v9 = vadd.f32 %v1616_v63, %v812_v44  ;;  %v948_v4 = vadd.f32 %v947_v2, %v885_v3  ;;  %v890_v63 = vmul.f32 %v1654_v28, %v1654_v28 }
 0x159   :  { %v949_v5 = vadd.f32 %v948_v4, %v886_v33  ;;  %v814_v10 = vadd.f32 %v1634_v6, %v813_v9  ;;  %v891_v6 = vmul.f32 %v1667_v35, %v1667_v35 }
 0x15b   :  { %v815_v16 = vadd.f32 %v814_v10, %v1660_v30  ;;  %v950_v13 = vadd.f32 %v949_v5, %v887_v42 }
 0x15d   :  { %v951_v7 = vadd.f32 %v950_v13, %v888_v1  ;;  %v816_v12 = vadd.f32 %v815_v16, %v1673_v38 }
 0x15f   :  { %v817_v17 = vadd.f32 %v1654_v28, %v816_v12  ;;  %v952_v14 = vadd.f32 %v951_v7, %v889_v15  ;;  %v755_v28 = vld [vmem:[%s1786_s3] sm:$0x1] }
 0x161   :  { %v818_v19 = vadd.f32 %v1667_v35, %v817_v17  ;;  %v953_v21 = vadd.f32 %v952_v14, %v890_v63  ;;  %v827_v35 = vld [vmem:[%s1787_s4] sm:$0x1] }
 0x163   :  { %v819_v30 = vrot.slane %v818_v19, 4  ;;  %v954_v29 = vadd.f32 %v953_v21, %v891_v6 }
 0x165   :  { %v820_v22 = vadd.f32 %v819_v30, %v818_v19  ;;  %v955_v23 = vrot.slane %v954_v29, 4 }
 0x167   :  { %v821_v24 = vrot.slane %v820_v22, 2  ;;  %v956_v36 = vadd.f32 %v955_v23, %v954_v29 }
 0x169   :  { %v822_v25 = vadd.f32 %v821_v24, %v820_v22  ;;  %v957_v38 = vrot.slane %v956_v36, 2 }
 0x16b   :  { %v823_v27 = vrot.slane %v822_v25, 1  ;;  %v958_v26 = vadd.f32 %v957_v38, %v956_v36 }
 0x16d   :  { %v824_v31 = vadd.f32 %v823_v27, %v822_v25  ;;  %v959_v34 = vrot.slane %v958_v26, 1 }
 0x16f   :  { %v825_v32 = vadd.f32 %v824_v31, %v755_v28  ;;  %v960_v39 = vadd.f32 %v959_v34, %v958_v26 }
 0x171   :  { %826 = vst [vmem:[%s1786_s3] sm:$0x1] %v825_v32  ;;  %v961_v49 = vadd.f32 %v960_v39, %v827_v35 }
 0x173   :  { %962 = vst [vmem:[%s1787_s4] sm:$0x1] %v961_v49 }

</bundles_post_ra>
